<compile_context>
chip_gen: v6e
topology: v6e:2x2x1
jax: 0.10.0
libtpu: 0.0.40
codegen_flags: <defaults>
</compile_context>

<pallas_src>
from functools import partial

import jax
import jax.numpy as jnp
from jax.experimental import pallas as pl
from jax.experimental.pallas import tpu as pltpu


# ---------------------------------------------------------------------------
# Fused Pallas kernel: CBL(P5) -> upsample -> concat -> CBL, all in VMEM,
# single invocation (no grid).  Batch is folded onto sublanes.
#   x5 : (N*C5, M5)       P5, channels/batch on sublanes, pixels on lanes
#   x4 : (N*C4, 4*M5)     P4 in phase-major pixel layout (di, dj, i, j)
#   p0 : (N*C0, N*C5+1)   [block-diag W0^T | b0]
#   p1 : (N*Cout, N*C0+N*C4+1)  [block-diag W1u^T | block-diag W1p^T | b1]
#   out: (N*Cout, 4*M5)   phase-major, lane-dense output slab
# ---------------------------------------------------------------------------
def _fused_neck_kernel(x5_ref, x4_ref, p0_ref, p1_ref, o_ref, *,
                       n_c5, n_c0, n_c4, neg_slope):
    p0 = p0_ref[...]
    w0, b0 = p0[:, :n_c5], p0[:, n_c5:]                  # (N*C0, N*C5), (N*C0, 1)
    p1 = p1_ref[...]
    w1u = p1[:, :n_c0]                                   # (N*Cout, N*C0)
    w1p = p1[:, n_c0:n_c0 + n_c4]                        # (N*Cout, N*C4)
    b1 = p1[:, n_c0 + n_c4:]                             # (N*Cout, 1)

    # layer idx 2: CBL (1x1 conv + folded-BN bias + LeakyReLU) at P5 resolution.
    a0 = jnp.dot(w0, x5_ref[...], preferred_element_type=jnp.float32) + b0
    a0 = jnp.maximum(a0, neg_slope * a0)                 # (N*C0, M5)

    # layers idx 3+4+5 fused:
    #   conv1(concat(up2x(a0), p4)) = up2x(W1u @ a0) + W1p @ p4 + b1
    # (1x1 conv commutes with nearest upsample; concat split by linearity;
    #  phase-major pixel layout turns nearest-2x into a 4-way lane replication).
    b_lo = jnp.dot(w1u, a0, preferred_element_type=jnp.float32)          # (N*Cout, M5)
    acc = jnp.dot(w1p, x4_ref[...], preferred_element_type=jnp.float32) + b1
    acc = acc + jnp.concatenate([b_lo, b_lo, b_lo, b_lo], axis=-1)       # exact nearest-2x
    o_ref[...] = jnp.maximum(acc, neg_slope * acc).astype(o_ref.dtype)


def fused_concat_path_neck(p4_nchw, p5_nchw, *, w0t, b0c, w1ut, w1pt, b1c,
                           neg_slope=0.1):
    """Whole neck in one gridless pallas_call; batch folded onto sublanes."""
    N, C4, H4, W4 = p4_nchw.shape
    _, C5, H5, W5 = p5_nchw.shape
    assert (H4, W4) == (2 * H5, 2 * W5)
    C0, Cout = w0t.shape[0], w1pt.shape[0]
    M5 = H5 * W5
    dt = p4_nchw.dtype
    eye = jnp.eye(N, dtype=dt)

    # Batch folded onto sublanes -> block-diagonal per-sample weights, tiled biases.
    w0_bd = jnp.kron(eye, w0t.astype(dt))                # (N*C0,   N*C5)
    w1u_bd = jnp.kron(eye, w1ut.astype(dt))              # (N*Cout, N*C0)
    w1p_bd = jnp.kron(eye, w1pt.astype(dt))              # (N*Cout, N*C4)
    b0_t = jnp.tile(b0c.astype(dt), (N, 1))              # (N*C0,   1)
    b1_t = jnp.tile(b1c.astype(dt), (N, 1))              # (N*Cout, 1)

    # Two resident param slabs -> 4 input DMAs total instead of 8.
    slab0 = jnp.concatenate([w0_bd, b0_t], axis=1)               # (N*C0,   N*C5+1)
    slab1 = jnp.concatenate([w1u_bd, w1p_bd, b1_t], axis=1)      # (N*Cout, N*C0+N*C4+1)

    # Activations: (batch, channels) on sublanes, pixels on lanes.
    x5 = p5_nchw.reshape(N * C5, M5)                     # free reshape (N,C adjacent)
    # P4 in phase-major layout (n, c, di, dj, i, j): nearest-2x == lane tiling.
    x4 = (p4_nchw.reshape(N, C4, H5, 2, W5, 2)
          .transpose(0, 1, 3, 5, 2, 4)
          .reshape(N * C4, 4 * M5))

    out_ph = pl.pallas_call(
        partial(_fused_neck_kernel, n_c5=N * C5, n_c0=N * C0, n_c4=N * C4,
                neg_slope=neg_slope),
        out_shape=jax.ShapeDtypeStruct((N * Cout, 4 * M5), dt),
        in_specs=[pl.BlockSpec(memory_space=pltpu.MemorySpace.VMEM)] * 4,
        out_specs=pl.BlockSpec(memory_space=pltpu.MemorySpace.VMEM),
    )(x5, x4, slab0, slab1)

    # Un-phase back to NCHW (wrapper-side layout plumbing, fused under jit).
    return (out_ph.reshape(N, Cout, 2, 2, H5, W5)
            .transpose(0, 1, 4, 2, 5, 3)
            .reshape(N, Cout, H4, W4))


# ---------------------------------------------------------------------------
# Neck module (fixed graph — replaces YAML parsing)
# ---------------------------------------------------------------------------
class ConcatEntirePathNeckPallas:
    # TODO(synk): parse_neck_for_concat_nas (YAML + backbone-driven graph
    # construction) has no Pallas equivalent; the concat-path layer graph is
    # fixed here and algebraically fused into a single kernel.
    def __init__(self, params, neg_slope=0.1):
        self.si = 2                       # number of backbone layers feeding the neck
        self.neg_slope = neg_slope
        w0, b0, w1, b1 = (jnp.asarray(params[k]) for k in ("w0", "b0", "w1", "b1"))
        c0 = w0.shape[1]                  # channels of the first CBL == up-branch width
        # Kernel-facing layout: weights as (Cout, Cin), biases as (Cout, 1) columns.
        self.w0t = w0.T                   # (C0,   C5)
        self.b0c = b0.T                   # (C0,   1)
        self.w1ut = w1[:c0].T             # (Cout, C0)  -- up-branch half of the concat
        self.w1pt = w1[c0:].T             # (Cout, C4)  -- P4 half of the concat
        self.b1c = b1.T                   # (Cout, 1)
        # jit once; params are closed over as compile-time constants so the
        # block-diag / slab prep costs nothing per call.
        self._jit_forward = jax.jit(
            partial(fused_concat_path_neck, w0t=self.w0t, b0c=self.b0c,
                    w1ut=self.w1ut, w1pt=self.w1pt, b1c=self.b1c,
                    neg_slope=neg_slope))

    def forward(self, backbone_feats_nchw):
        """backbone_feats_nchw: [P4 (N,8,16,16), P5 (N,16,8,8)] in NCHW (y[0], y[1])."""
        p4, p5 = backbone_feats_nchw      # last backbone output (f == -1) feeds layer idx 2
        return self._jit_forward(p4, p5)


# ---------------------------------------------------------------------------
# Pure-JAX reference: literal `_forward_once` over the same fixed graph.
# ---------------------------------------------------------------------------
def _ref_forward(feats_nchw, params, neg_slope=0.1):
    p4, p5 = feats_nchw
    y = [p4, p5]

    def cbl(x, w, b):                     # x NCHW, w (Cin, Cout), b (1, Cout)
        acc = jnp.einsum("nchw,cd->ndhw", x, w) + b[0][None, :, None, None]
        return jnp.where(acc > 0, acc, neg_slope * acc)

    layers = [
        (-1, lambda x: cbl(x, params["w0"], params["b0"])),                    # idx 2
        (-1, lambda x: jnp.repeat(jnp.repeat(x, 2, axis=2), 2, axis=3)),       # idx 3
        ([-1, 0], lambda xs: jnp.concatenate(xs, axis=1)),                     # idx 4
        (-1, lambda x: cbl(x, params["w1"], params["b1"])),                    # idx 5
    ]
    x = y[-1]
    for f, fn in layers:
        if f != -1:
            x = y[f] if isinstance(f, int) else [x if j == -1 else y[j] for j in f]
        x = fn(x)
        y.append(x)
    return x


# ---------------------------------------------------------------------------
# Main
# ---------------------------------------------------------------------------
if __name__ == "__main__":
    key = jax.random.PRNGKey(0)
    k_p4, k_p5, k_w0, k_b0, k_w1, k_b1 = jax.random.split(key, 6)

    N = 2
    p4 = jax.random.normal(k_p4, (N, 8, 16, 16), dtype=jnp.float32)   # backbone idx 0
    p5 = jax.random.normal(k_p5, (N, 16, 8, 8), dtype=jnp.float32)    # backbone idx 1

    # Folded conv+BN parameters (eval mode): w (Cin, Cout), b (1, Cout).
    params = {
        "w0": 0.1 * jax.random.normal(k_w0, (16, 8), dtype=jnp.float32),
        "b0": 0.1 * jax.random.normal(k_b0, (1, 8), dtype=jnp.float32),
        "w1": 0.1 * jax.random.normal(k_w1, (16, 8), dtype=jnp.float32),
        "b1": 0.1 * jax.random.normal(k_b1, (1, 8), dtype=jnp.float32),
    }

    neck = ConcatEntirePathNeckPallas(params)
    out = jax.block_until_ready(neck.forward([p4, p5]))

    ref = jax.block_until_ready(_ref_forward([p4, p5], params))
    assert out.shape == (N, 8, 16, 16), out.shape
    assert jnp.allclose(out, ref, atol=1e-4, rtol=1e-4), float(jnp.abs(out - ref).max())

    print("KERNEL_OK")
</pallas_src>

<mosaic_0001>
module attributes {stable_mosaic.version = 11 : i64} {
  func.func @_fused_neck_kernel(%arg0: memref<32x64xf32, #tpu.memory_space<vmem>>, %arg1: memref<16x256xf32, #tpu.memory_space<vmem>>, %arg2: memref<16x33xf32, #tpu.memory_space<vmem>>, %arg3: memref<16x33xf32, #tpu.memory_space<vmem>>, %arg4: memref<16x256xf32, #tpu.memory_space<vmem>>) attributes {dimension_semantics = [], scalar_prefetch = 0 : i64, scratch_operands = 0 : i64, tpu.core_type = #tpu.core_type<tc>} {
    %c0 = arith.constant 0 : index
    %c0_0 = arith.constant 0 : index
    %0 = vector.load %arg2[%c0, %c0_0] : memref<16x33xf32, #tpu.memory_space<vmem>>, vector<16x33xf32>
    %1 = vector.extract_strided_slice %0 {offsets = [0, 0], sizes = [16, 32], strides = [1, 1]} : vector<16x33xf32> to vector<16x32xf32>
    %2 = vector.extract_strided_slice %0 {offsets = [0, 32], sizes = [16, 1], strides = [1, 1]} : vector<16x33xf32> to vector<16x1xf32>
    %c0_1 = arith.constant 0 : index
    %c0_2 = arith.constant 0 : index
    %3 = vector.load %arg3[%c0_1, %c0_2] : memref<16x33xf32, #tpu.memory_space<vmem>>, vector<16x33xf32>
    %4 = vector.extract_strided_slice %3 {offsets = [0, 0], sizes = [16, 16], strides = [1, 1]} : vector<16x33xf32> to vector<16x16xf32>
    %5 = vector.extract_strided_slice %3 {offsets = [0, 16], sizes = [16, 16], strides = [1, 1]} : vector<16x33xf32> to vector<16x16xf32>
    %6 = vector.extract_strided_slice %3 {offsets = [0, 32], sizes = [16, 1], strides = [1, 1]} : vector<16x33xf32> to vector<16x1xf32>
    %c0_3 = arith.constant 0 : index
    %c0_4 = arith.constant 0 : index
    %7 = vector.load %arg0[%c0_3, %c0_4] : memref<32x64xf32, #tpu.memory_space<vmem>>, vector<32x64xf32>
    %cst = arith.constant dense<0.000000e+00> : vector<16x64xf32>
    %8 = tpu.matmul %1, %7, %cst {dimension_numbers = #tpu.dot_dimension_numbers<[1], [0], [0], [1], [0, 0, 1, 1], [], []>} : vector<16x32xf32>, vector<32x64xf32>, vector<16x64xf32> -> vector<16x64xf32>
    %9 = vector.broadcast %2 : vector<16x1xf32> to vector<16x64xf32>
    %10 = arith.addf %8, %9 : vector<16x64xf32>
    %cst_5 = arith.constant 1.000000e-01 : f32
    %11 = vector.broadcast %cst_5 : f32 to vector<16x64xf32>
    %12 = arith.mulf %11, %10 : vector<16x64xf32>
    %13 = arith.maximumf %10, %12 : vector<16x64xf32>
    %cst_6 = arith.constant dense<0.000000e+00> : vector<16x64xf32>
    %14 = tpu.matmul %4, %13, %cst_6 {dimension_numbers = #tpu.dot_dimension_numbers<[1], [0], [0], [1], [0, 0, 1, 1], [], []>} : vector<16x16xf32>, vector<16x64xf32>, vector<16x64xf32> -> vector<16x64xf32>
    %c0_7 = arith.constant 0 : index
    %c0_8 = arith.constant 0 : index
    %15 = vector.load %arg1[%c0_7, %c0_8] : memref<16x256xf32, #tpu.memory_space<vmem>>, vector<16x256xf32>
    %cst_9 = arith.constant dense<0.000000e+00> : vector<16x256xf32>
    %16 = tpu.matmul %5, %15, %cst_9 {dimension_numbers = #tpu.dot_dimension_numbers<[1], [0], [0], [1], [0, 0, 1, 1], [], []>} : vector<16x16xf32>, vector<16x256xf32>, vector<16x256xf32> -> vector<16x256xf32>
    %17 = vector.broadcast %6 : vector<16x1xf32> to vector<16x256xf32>
    %18 = arith.addf %16, %17 : vector<16x256xf32>
    %19 = tpu.concatenate %14, %14, %14, %14 in 1 : vector<16x64xf32>, vector<16x64xf32>, vector<16x64xf32>, vector<16x64xf32> -> vector<16x256xf32>
    %20 = arith.addf %18, %19 : vector<16x256xf32>
    %cst_10 = arith.constant 1.000000e-01 : f32
    %21 = vector.broadcast %cst_10 : f32 to vector<16x256xf32>
    %22 = arith.mulf %21, %20 : vector<16x256xf32>
    %23 = arith.maximumf %20, %22 : vector<16x256xf32>
    %c0_11 = arith.constant 0 : index
    %c0_12 = arith.constant 0 : index
    %24 = vector.load %arg4[%c0_11, %c0_12] : memref<16x256xf32, #tpu.memory_space<vmem>>, vector<16x256xf32>
    tpu.vector_store %arg4[%c0_11, %c0_12], %23 {strides = array<i32>} : memref<16x256xf32, #tpu.memory_space<vmem>>, vector<16x256xf32>,
    return
  }
}

</mosaic_0001>

<bundles_post_ra>
// kernel: fused_concat_path_neck.1
= control target key start
LH: loop header
LB: loop body
LE: loop exit
PB: predicated region body
PF: predicated region fallthrough
CT: control target
= control target key end

     0   :  { %vm35_vm0 = vcmask 261120   ;;  %v369_v2 = vmov 32   ;;  %s370_s29 = smov 112   ;;  %vm119_vm1 = vcmask 130048   ;;  %v371_v24 = vmov 0.0   ;;  %s372_s11 = smov 64   ;;  %s452_s0 = inlined_call_operand.vmem [shape: f32[32,64], index: 0, kind: input, shape index: {}]   ;;  %s453_s2 = inlined_call_operand.vmem [shape: f32[16,33], index: 2, kind: input, shape index: {}]   ;;  %s454_s3 = inlined_call_operand.vmem [shape: f32[16,33], index: 3, kind: input, shape index: {}]   ;;  %s455_s1 = inlined_call_operand.vmem [shape: f32[16,256], index: 1, kind: input, shape index: {}]   ;;  %s456_s4 = inlined_call_operand.vmem [shape: f32[16,256], index: 4, kind: output, shape index: {}]  }
   0x1   :  { %v24_v0 = vld [vmem:[%s452_s0 + $0x18] sm:$0xff]  ;;  %v23_v1 = vld [vmem:[%s452_s0 + $0x10] sm:$0xff]  ;;  %367 = vset.pattern.permute.xlu0 %v369_v2  ;;  %368 = vset.pattern.permute.xlu1 %v369_v2  ;;  %v17_v3 = vld [vmem:[%s453_s2] sm:$0xff]  ;;  %vm306_vm2 = vcmask 523264  }
   0x2   :  { %345 = vmatprep.subr.mxu0 %v24_v0  ;;  %v22_v4 = vld [vmem:[%s452_s0 + $0x8] sm:$0xff]  ;;  %353 = vmatprep.mubr.msk.f32.mxu0 %vm35_vm0, %v17_v3  ;;  %v19_v6 = vld [vmem:[%s454_s3] sm:$0xff]  ;;  %v204_v19 = vld [vmem:[%s455_s1 + $0x18] sm:$0xff] }
   0x3   :  { %346 = vmatpush3.msra.mxu0 %v24_v0  ;;  %v18_v5 = vld [vmem:[%s453_s2 + $0x8] sm:$0xff]  ;;  %v21_v7 = vld [vmem:[%s452_s0] sm:$0xff]  ;;  %213 = vrot.lane.b32.xlu1 %v19_v6, %s370_s29  ;;  %v203_v20 = vld [vmem:[%s455_s1 + $0x10] sm:$0xff] }
   0x4   :  { %347 = vmatprep.subr.mxu0 %v23_v1  ;;  %32 = vperm.xlu0 %367, %v18_v5   ;;  %v20_v8 = vld [vmem:[%s454_s3 + $0x8] sm:$0xff]  ;;  %v201_v22 = vld [vmem:[%s455_s1] sm:$0xff] }
   0x5   :  { %348 = vmatpush3.msra.mxu0 %v23_v1  ;;  %360 = vmatprep.mubr.msk.f32.mxu1 %vm119_vm1, %v19_v6  ;;  %v202_v21 = vld [vmem:[%s455_s1 + $0x8] sm:$0xff] }
   0x6   :  { %349 = vmatprep.subr.mxu0 %v22_v4 }
   0x7   :  { %350 = vmatpush3.msra.mxu0 %v22_v4  ;;  %215 = vrot.lane.b32.xlu1 %v20_v8, %s370_s29 }
   0x8   :  { %351 = vmatprep.subr.mxu0 %v21_v7  ;;  %27 = vperm.xlu0 %367, %v17_v3  }
   0x9   :  { %352 = vmatpush3.msra.mxu0 %v21_v7 }
   0xa   :  { %354 = vmatmul.mubr.msk.f32.vlgmr.msra.gmra.mxu0 %vm35_vm0, %v18_v5 }
   0xb   :  { %210 = vperm.xlu1 %368, %v20_v8  }
   0xc   :  { %206 = vperm.xlu0 %367, %v19_v6  }
  0x75   :  { %v214_v23 = vpop.permute.xlu1 %213 }
  0x79   :  { %v216_v25 = vpop.permute.xlu1 %215 }
  0x7f   :  { %v33_v9 = vpop.permute.xlu0 %32 }
  0x83   :  { %v28_v12 = vpop.permute.xlu0 %27 }
  0x86   :  { %v211_v31 = vpop.permute.xlu1 %210 }
  0x87   :  { %v207_v33 = vpop.permute.xlu0 %206 }
  0xca   :  { %v355_v10 = vpop.f32.mrf.mxu0 }
  0xcb   :  { %v112_v11 = vadd.f32 %v355_v10, %v33_v9 }
  0xcc   :  { %v106_v13 = vpop.f32.mrf.mxu0 }
  0xcd   :  { %v116_v14 = vmul.f32 0.1, %v112_v11  ;;  %v107_v15 = vadd.f32 %v106_v13, %v28_v12 }
  0xcf   :  { %v115_v16 = vmul.f32 0.1, %v107_v15  ;;  %v118_v17 = vmax.f32 %v112_v11, %v116_v14 }
  0xd1   :  { %v117_v18 = vmax.f32 %v107_v15, %v115_v16  ;;  %356 = vmatprep.subr.mxu1 %v118_v17 }
  0xd2   :  { %357 = vmatpush3.msra.mxu1 %v118_v17 }
  0xd3   :  { %358 = vmatprep.subr.mxu1 %v117_v18 }
  0xd4   :  { %359 = vmatpush3.msra.mxu1 %v117_v18 }
  0xd5   :  { %361 = vmatmul.mubr.msk.f32.vlgmr.msra.gmra.mxu1 %vm119_vm1, %v20_v8  ;;  %249 = vmatprep.subr.mxu1 %v204_v19 }
  0xd6   :  { %250 = vmatpush1.msra.mxu1 %v203_v20  ;;  %285 = vmatprep.mubr.f32.mxu1 %v371_v24 }
  0xd7   :  { %251 = vmatprep.subr.mxu1 %v202_v21 }
  0xd8   :  { %252 = vmatpush1.msra.mxu1 %v201_v22 }
  0xd9   :  { %333 = vmatmul.mubr.msk.f32.vlgmr.msra.gmra.mxu1 %vm119_vm1, %v214_v23 }
  0xda   :  { %291 = vmatprep.mubr.f32.mxu1 %v371_v24 }
  0xdd   :  { %334 = vmatmul.mubr.msk.f32.gmra.mxu1 %vm119_vm1, %v216_v25 }
 0x195   :  { %v362_v26 = vpop.f32.mrf.mxu1 }
 0x196   :  { %302 = vrot.lane.b32.xlu1 %v362_v26, %s372_s11 }
 0x197   :  { %v192_v27 = vpop.f32.mrf.mxu1 }
 0x198   :  { %300 = vrot.lane.b32.xlu0 %v192_v27, %s372_s11 }
 0x199   :  { %v287_v28 = vpop.f32.mrf.mxu1 }
 0x19a   :  { %v288_v38 = vadd.f32 %v287_v28, %v207_v33 }
 0x19b   :  { %v289_v29 = vpop.f32.mrf.mxu1 }
 0x19c   :  { %v290_v39 = vadd.f32 %v289_v29, %v207_v33 }
 0x19d   :  { %v293_v30 = vpop.f32.mrf.mxu1 }
 0x19e   :  { %v294_v34 = vadd.f32 %v293_v30, %v211_v31 }
 0x19f   :  { %v295_v32 = vpop.f32.mrf.mxu1 }
 0x1a0   :  { %v296_v35 = vadd.f32 %v295_v32, %v211_v31 }
 0x208   :  { %v303_v36 = vpop.permute.xlu1 %302 }
 0x209   :  { %v308_v37 = vsel %vm306_vm2, %v362_v26, %v303_v36 }
 0x20a   :  { %v311_v40 = vadd.f32 %v308_v37, %v294_v34  ;;  %v312_v41 = vadd.f32 %v308_v37, %v296_v35  ;;  %v301_v42 = vpop.permute.xlu0 %300 }
 0x20b   :  { %v307_v43 = vsel %vm306_vm2, %v192_v27, %v301_v42 }
 0x20c   :  { %v315_v44 = vmul.f32 0.1, %v311_v40  ;;  %v316_v45 = vmul.f32 0.1, %v312_v41  ;;  %v309_v46 = vadd.f32 %v307_v43, %v288_v38  ;;  %v310_v47 = vadd.f32 %v307_v43, %v290_v39 }
 0x20e   :  { %v319_v48 = vmax.f32 %v311_v40, %v315_v44  ;;  %v320_v49 = vmax.f32 %v312_v41, %v316_v45  ;;  %v313_v50 = vmul.f32 0.1, %v309_v46  ;;  %v314_v51 = vmul.f32 0.1, %v310_v47 }
 0x210   :  { %323 = vst [vmem:[%s456_s4 + $0x10] sm:$0xff] %v319_v48  ;;  %324 = vst [vmem:[%s456_s4 + $0x18] sm:$0xff] %v320_v49  ;;  %v317_v52 = vmax.f32 %v309_v46, %v313_v50  ;;  %v318_v53 = vmax.f32 %v310_v47, %v314_v51 }
 0x212   :  { %321 = vst [vmem:[%s456_s4] sm:$0xff] %v317_v52  ;;  %322 = vst [vmem:[%s456_s4 + $0x8] sm:$0xff] %v318_v53 }

</bundles_post_ra>
